<compile_context>
chip_gen: v7x
topology: tpu7x:2x2x1
jax: 0.10.0
libtpu: 0.0.40
codegen_flags: <defaults>
</compile_context>

<pallas_src>
import functools

import numpy as np
import jax
import jax.numpy as jnp
from jax import lax
from jax.experimental import pallas as pl
from jax.experimental.pallas import tpu as pltpu

_EPS = 1e-12          # F.normalize eps
_NUM_DICT_KEYS = 3.0  # len(cluster_result) in the PyTorch code (dict with 3 keys)


def _l2_normalize(x):
    n = jnp.sqrt(jnp.sum(x * x, axis=1, keepdims=True))
    return x / jnp.maximum(n, _EPS)


def _row_logsumexp(x):
    m = jnp.max(x, axis=1, keepdims=True)
    return m + jnp.log(jnp.sum(jnp.exp(x - m), axis=1, keepdims=True))


def _cmpc_dir_kernel(anc_ref, oth_ref, pro_ref, dinv_ref, dnxt_ref, loss_ref,
                     *, temperature, R):
    """One contrastive direction per grid point: loss_ii + loss_ip column (bs, 1)."""
    anc = anc_ref[0].astype(jnp.float32)      # (bs, D)  anchor embeddings
    oth = oth_ref[0].astype(jnp.float32)      # (bs, D)  positive ("other") embeddings
    pro32 = pro_ref[0].astype(jnp.float32)    # (R*bs, D) normalized gathered centroids
    dinv = dinv_ref[0]                        # (R, bs) 1/density, lane-dense
    dnxt = dnxt_ref[0]                        # (R, bs) 1/density shifted (dens[j+1])

    bs = anc.shape[0]
    inv_t = 1.0 / temperature
    inv_k = 1.0 / _NUM_DICT_KEYS

    row_i = lax.broadcasted_iota(jnp.int32, (bs, bs), 0)
    col_j = lax.broadcasted_iota(jnp.int32, (bs, bs), 1)
    eye = row_i == col_j
    lower = col_j < row_i

    an = _l2_normalize(anc)
    on = _l2_normalize(oth)

    # ---- single fused MXU launch: bf16 operands, f32 accumulation ----
    rhs = jnp.concatenate([on, pro32], axis=0).astype(jnp.bfloat16)   # ((R+1)*bs, D)
    sims = lax.dot_general(an.astype(jnp.bfloat16), rhs,
                           (((1,), (1,)), ((), ())),
                           preferred_element_type=jnp.float32)        # (bs, (R+1)*bs)

    # ---- positive (diagonal) logits in f32, batched over all R proto rounds ----
    diag_io = jnp.sum(an * on, axis=1, keepdims=True)                 # (bs, 1)
    an_rep = jnp.concatenate([an] * R, axis=0)                        # (R*bs, D)
    diag_pr = jnp.sum(an_rep * pro32, axis=1, keepdims=True)          # (R*bs, 1)

    # ---- instance <-> instance cross-entropy (row-wise) ----
    loss = -diag_io * inv_t + _row_logsumexp(sims[:, :bs] * inv_t)    # (bs, 1)

    # ---- instance <-> prototype cross-entropy ----
    loss_ip = jnp.zeros((bs, 1), jnp.float32)
    for r in range(R):
        ps = sims[:, (r + 1) * bs:(r + 2) * bs]                       # (bs, bs)
        inv_row = dinv[r:r + 1, :]                                    # 1/dens[j]    (1, bs)
        inv_nxt = dnxt[r:r + 1, :]                                    # 1/dens[j+1]  (1, bs)
        inv_t0 = dinv[r:r + 1, 0:1]                                   # 1/dens[0]    (1, 1)
        # divisor reproducing torch's column-wise broadcast of `proto_logits /= temp`
        # applied AFTER the [diag | off-diag] concat
        inv_div = jnp.where(eye, inv_t0, jnp.where(lower, inv_nxt, inv_row))
        ce = (-diag_pr[r * bs:(r + 1) * bs, :] * inv_t0
              + _row_logsumexp(ps * inv_div))
        loss_ip = (loss_ip + ce) * inv_k     # torch divides the *running* sum each round
    loss_ref[0] = loss + loss_ip


def ir_cmpc_pallas(audio_emb, frame_emb, audio_cluster, frame_cluster, video_index,
                   *, temperature, delta, ka, R):
    """JAX/Pallas implementation of IR_CMPC.forward (scalar loss, float32)."""
    bs, D = audio_emb.shape
    a32 = audio_emb.astype(jnp.float32)
    f32 = frame_emb.astype(jnp.float32)

    # --- plain-JAX glue: data-dependent gathers + per-cluster dedup'd normalization ----
    def gather(cluster):
        pn_rows, raw_rows, dinv_rows = [], [], []
        for r in range(R):
            cents = cluster['centroids'][r].astype(jnp.float32)          # (K, D)
            norms = jnp.maximum(
                jnp.sqrt(jnp.sum(cents * cents, axis=1, keepdims=True)), _EPS)
            cents_n = cents / norms                                      # normalize K rows once
            dens_inv = 1.0 / cluster['density'][r].astype(jnp.float32)   # (K,)
            ids = cluster['inst2cluster'][r][video_index]                # (bs,)
            pn_rows.append(cents_n[ids])                                 # (bs, D)
            raw_rows.append(cents[ids])                                  # (bs, D) raw, for rho
            dinv_rows.append(dens_inv[ids])                              # (bs,)
        pn = jnp.concatenate(pn_rows, axis=0)                            # (R*bs, D)
        raw = jnp.stack(raw_rows, axis=0)                                # (R, bs, D)
        dinv = jnp.stack(dinv_rows, axis=0)                              # (R, bs)
        return pn, raw, dinv

    fpn, fraw, fdi = gather(frame_cluster)
    apn, araw, adi = gather(audio_cluster)
    fdin = jnp.roll(fdi, shift=-1, axis=1)   # 1/dens[j+1]; wrapped value never selected
    adin = jnp.roll(adi, shift=-1, axis=1)

    # direction 0: audio anchor vs frame (v2f); direction 1: frame anchor vs audio (f2v)
    anchors = jnp.stack([a32, f32], axis=0)                              # (2, bs, D)  f32
    others = jnp.stack([f32, a32], axis=0)                               # (2, bs, D)  f32
    protos = jnp.stack([fpn, apn], axis=0).astype(jnp.bfloat16)          # (2, R*bs, D) bf16
    dinv = jnp.stack([fdi, adi], axis=0)                                 # (2, R, bs)
    dnxt = jnp.stack([fdin, adin], axis=0)                               # (2, R, bs)

    kern = functools.partial(_cmpc_dir_kernel, temperature=float(temperature), R=R)
    mm_flops = 2 * (2 * bs * ((R + 1) * bs) * D)          # both directions
    ew_flops = 2 * (12 * bs * (R + 1) * bs + 8 * bs * D)
    cost = pl.CostEstimate(
        flops=int(mm_flops + ew_flops),
        transcendentals=int(2 * bs * (R + 1) * bs),
        bytes_accessed=int(anchors.nbytes + others.nbytes + protos.nbytes
                           + dinv.nbytes + dnxt.nbytes + 2 * bs * 4))

    # TODO(synk): at production sizes (bs >= 1024, R = 3) add an anchor-row grid axis with
    # BlockSpec double-buffering and set vmem_limit_bytes explicitly for v7x (64 MiB VMEM);
    # bs as a multiple of 128 also makes every per-r lane slice naturally aligned.
    loss_dir = pl.pallas_call(
        kern,
        out_shape=jax.ShapeDtypeStruct((2, bs, 1), jnp.float32),
        grid=(2,),
        in_specs=[pl.BlockSpec((1, bs, D), lambda d: (d, 0, 0)),
                  pl.BlockSpec((1, bs, D), lambda d: (d, 0, 0)),
                  pl.BlockSpec((1, R * bs, D), lambda d: (d, 0, 0)),
                  pl.BlockSpec((1, R, bs), lambda d: (d, 0, 0)),
                  pl.BlockSpec((1, R, bs), lambda d: (d, 0, 0))],
        out_specs=pl.BlockSpec((1, bs, 1), lambda d: (d, 0, 0)),
        compiler_params=pltpu.CompilerParams(dimension_semantics=("parallel",)),
        cost_estimate=cost,
    )(anchors, others, protos, dinv, dnxt)                               # (2, bs, 1)

    # --- Gaussian-CDF sample re-weighting (tiny; the reference does this in numpy) ---------
    an = a32 / jnp.maximum(jnp.linalg.norm(a32, axis=1, keepdims=True), _EPS)
    fn = f32 / jnp.maximum(jnp.linalg.norm(f32, axis=1, keepdims=True), _EPS)
    diag_af = jnp.sum(an * fn, axis=1)                                   # (bs,)
    cdiag = jnp.sum(araw * fraw, axis=(0, 2))                            # exact raw-centroid diag
    rho = diag_af - cdiag
    std = jnp.std(rho)                                                   # ddof=0, like np.std
    mu = jnp.mean(rho) + delta * std
    sigma = jnp.maximum(std * (ka ** 0.5), 1e-20)                        # guard all-equal rho
    order = jnp.argsort(rho)
    y = (1.0 / (np.sqrt(2.0 * np.pi))) / sigma * jnp.exp(
        -0.5 * ((rho[order] - mu) / sigma) ** 2)
    y = jnp.cumsum(y)
    w = y[jnp.argsort(order)] / y[-1]                                    # (bs,)

    inv_sw = 1.0 / jnp.sum(w)
    loss_v2f = jnp.sum(w * loss_dir[0, :, 0]) * inv_sw
    loss_f2v = jnp.sum(w * loss_dir[1, :, 0]) * inv_sw
    return loss_v2f + loss_f2v


# ---------------------- pure numpy reference (mirrors PyTorch) ----------------------------
def ir_cmpc_reference(audio_emb, frame_emb, audio_cluster, frame_cluster,
                      video_index, temperature, delta, ka, R):
    a = np.asarray(audio_emb, np.float32)
    f = np.asarray(frame_emb, np.float32)
    idx = np.asarray(video_index)
    bs = a.shape[0]

    def normalize(x):
        n = np.linalg.norm(x, axis=1, keepdims=True)
        return x / np.maximum(n, 1e-12)

    def ce_none(logits):
        m = logits.max(axis=1, keepdims=True)
        lse = m[:, 0] + np.log(np.exp(logits - m).sum(axis=1))
        return -logits[:, 0] + lse

    def diag_offdiag(sim):
        eye = np.eye(bs, dtype=bool)
        pos = sim[eye].reshape(bs, 1)
        neg = sim[~eye].reshape(bs, bs - 1)
        return np.concatenate([pos, neg], axis=1)

    def inst_inst(anchor, pos):
        sim = normalize(anchor) @ normalize(pos).T
        return ce_none(diag_offdiag(sim) / temperature)

    def inst_proto(anchor, cluster):
        loss = np.zeros(bs, np.float64)
        an = normalize(anchor)
        for r in range(R):
            protos = normalize(np.asarray(cluster['centroids'][r], np.float32))
            ids = np.asarray(cluster['inst2cluster'][r])[idx]
            sim = an @ protos[ids].T
            logits = diag_offdiag(sim)
            temp = np.asarray(cluster['density'][r], np.float32)[ids]
            logits = logits / temp          # column-wise broadcast as in torch
            loss = loss + ce_none(logits)
            loss = loss / 3.0
        return loss

    l_v2f_ii = inst_inst(a, f)
    l_f2v_ii = inst_inst(f, a)
    l_v2f_ip = inst_proto(a, frame_cluster)
    l_f2v_ip = inst_proto(f, audio_cluster)

    afm = normalize(a) @ normalize(f).T
    i2c = np.zeros((bs, bs))
    for r in range(R):
        va = np.asarray(audio_cluster['inst2cluster'][r])[idx]
        vf = np.asarray(frame_cluster['inst2cluster'][r])[idx]
        i2c += (np.asarray(audio_cluster['centroids'][r], np.float32)[va]
                @ np.asarray(frame_cluster['centroids'][r], np.float32)[vf].T)
    rho = (afm - i2c).diagonal()
    sorted_rho = np.sort(rho)
    argsort_rho = np.argsort(rho)
    mu = rho.mean() + delta * rho.std()
    sigma = rho.std() * ka ** 0.5
    y = 1 / (np.sqrt(2 * np.pi) * sigma) * np.exp(-0.5 * ((sorted_rho - mu) / sigma) ** 2)
    y = y.cumsum()
    y = y / y[-1]
    w = y[np.argsort(argsort_rho)]
    loss_v2f = np.sum(w * (l_v2f_ii + l_v2f_ip)) / np.sum(w)
    loss_f2v = np.sum(w * (l_f2v_ii + l_f2v_ip)) / np.sum(w)
    return loss_v2f + loss_f2v


if __name__ == "__main__":
    bs, D, R, N = 8, 32, 2, 32
    Ks = [16, 12]
    temperature, delta, ka = 0.1, 0.3, 2.0

    key = jax.random.PRNGKey(0)
    keys = jax.random.split(key, 8)
    audio_emb = jax.random.normal(keys[0], (bs, D), jnp.float32)
    frame_emb = jax.random.normal(keys[1], (bs, D), jnp.float32)
    video_index = jax.random.permutation(keys[2], N)[:bs]

    def make_cluster(kseed):
        ks = jax.random.split(kseed, 3 * R)
        return {
            'inst2cluster': [jax.random.randint(ks[3 * r], (N,), 0, Ks[r])
                             for r in range(R)],
            'centroids': [jax.random.normal(ks[3 * r + 1], (Ks[r], D), jnp.float32)
                          for r in range(R)],
            'density': [jax.random.uniform(ks[3 * r + 2], (Ks[r],), jnp.float32,
                                           0.2, 1.0) for r in range(R)],
        }

    audio_cluster = make_cluster(keys[3])
    frame_cluster = make_cluster(keys[4])

    loss = ir_cmpc_pallas(audio_emb, frame_emb, audio_cluster, frame_cluster,
                          video_index, temperature=temperature, delta=delta,
                          ka=ka, R=R)
    loss = jax.block_until_ready(loss)

    ref = ir_cmpc_reference(audio_emb, frame_emb, audio_cluster, frame_cluster,
                            video_index, temperature, delta, ka, R)
    assert np.isfinite(float(loss))
    # bf16 MXU operands with f32 accumulation: allow ~2e-2 relative vs the f32/f64 reference
    assert abs(float(loss) - float(ref)) <= 2e-2 * max(1.0, abs(float(ref))), \
        (float(loss), float(ref))
    print("KERNEL_OK")
</pallas_src>

<mosaic_0001>
module attributes {stable_mosaic.version = 11 : i64} {
  func.func @_cmpc_dir_kernel(%arg0: i32, %arg1: memref<1x8x32xf32, #tpu.memory_space<vmem>>, %arg2: memref<1x8x32xf32, #tpu.memory_space<vmem>>, %arg3: memref<1x16x32xbf16, #tpu.memory_space<vmem>>, %arg4: memref<1x2x8xf32, #tpu.memory_space<vmem>>, %arg5: memref<1x2x8xf32, #tpu.memory_space<vmem>>, %arg6: memref<1x8x1xf32, #tpu.memory_space<vmem>>) attributes {dimension_semantics = [#tpu.dimension_semantics<parallel>], iteration_bounds = array<i64: 2>, scalar_prefetch = 0 : i64, scratch_operands = 0 : i64, tpu.core_type = #tpu.core_type<tc>, window_params = [{transform_indices = @transform_0, window_bounds = array<i64: 1, 8, 32>}, {transform_indices = @transform_1, window_bounds = array<i64: 1, 8, 32>}, {transform_indices = @transform_2, window_bounds = array<i64: 1, 16, 32>}, {transform_indices = @transform_3, window_bounds = array<i64: 1, 2, 8>}, {transform_indices = @transform_4, window_bounds = array<i64: 1, 2, 8>}, {transform_indices = @transform_5, window_bounds = array<i64: 1, 8, 1>}]} {
    %c0 = arith.constant 0 : index
    %c0_0 = arith.constant 0 : index
    %c0_1 = arith.constant 0 : index
    %0 = vector.load %arg1[%c0, %c0_0, %c0_1] : memref<1x8x32xf32, #tpu.memory_space<vmem>>, vector<1x8x32xf32>
    %1 = vector.shape_cast %0 : vector<1x8x32xf32> to vector<8x32xf32>
    %c0_2 = arith.constant 0 : index
    %c0_3 = arith.constant 0 : index
    %c0_4 = arith.constant 0 : index
    %2 = vector.load %arg2[%c0_2, %c0_3, %c0_4] : memref<1x8x32xf32, #tpu.memory_space<vmem>>, vector<1x8x32xf32>
    %3 = vector.shape_cast %2 : vector<1x8x32xf32> to vector<8x32xf32>
    %c0_5 = arith.constant 0 : index
    %c0_6 = arith.constant 0 : index
    %c0_7 = arith.constant 0 : index
    %4 = vector.load %arg3[%c0_5, %c0_6, %c0_7] : memref<1x16x32xbf16, #tpu.memory_space<vmem>>, vector<1x16x32xbf16>
    %5 = vector.shape_cast %4 : vector<1x16x32xbf16> to vector<16x32xbf16>
    %6 = arith.extf %5 : vector<16x32xbf16> to vector<16x32xf32>
    %c0_8 = arith.constant 0 : index
    %c0_9 = arith.constant 0 : index
    %c0_10 = arith.constant 0 : index
    %7 = vector.load %arg4[%c0_8, %c0_9, %c0_10] : memref<1x2x8xf32, #tpu.memory_space<vmem>>, vector<1x2x8xf32>
    %8 = vector.shape_cast %7 : vector<1x2x8xf32> to vector<2x8xf32>
    %c0_11 = arith.constant 0 : index
    %c0_12 = arith.constant 0 : index
    %c0_13 = arith.constant 0 : index
    %9 = vector.load %arg5[%c0_11, %c0_12, %c0_13] : memref<1x2x8xf32, #tpu.memory_space<vmem>>, vector<1x2x8xf32>
    %10 = vector.shape_cast %9 : vector<1x2x8xf32> to vector<2x8xf32>
    %11 = tpu.iota {dimensions = array<i32: 0>} : vector<8x8xi32>
    %12 = tpu.iota {dimensions = array<i32: 1>} : vector<8x8xi32>
    %13 = arith.cmpi eq, %11, %12 : vector<8x8xi32>
    %14 = arith.cmpi slt, %12, %11 : vector<8x8xi32>
    %15 = arith.mulf %1, %1 : vector<8x32xf32>
    %cst = arith.constant dense<0.000000e+00> : vector<8xf32>
    %16 = vector.multi_reduction <add>, %15, %cst [1] : vector<8x32xf32> to vector<8xf32>
    %17 = vector.shape_cast %16 : vector<8xf32> to vector<8x1xf32>
    %18 = math.sqrt %17 : vector<8x1xf32>
    %cst_14 = arith.constant 9.99999996E-13 : f32
    %19 = vector.broadcast %cst_14 : f32 to vector<8x1xf32>
    %20 = arith.maximumf %18, %19 : vector<8x1xf32>
    %21 = vector.broadcast %20 : vector<8x1xf32> to vector<8x32xf32>
    %22 = arith.divf %1, %21 : vector<8x32xf32>
    %23 = arith.mulf %3, %3 : vector<8x32xf32>
    %cst_15 = arith.constant dense<0.000000e+00> : vector<8xf32>
    %24 = vector.multi_reduction <add>, %23, %cst_15 [1] : vector<8x32xf32> to vector<8xf32>
    %25 = vector.shape_cast %24 : vector<8xf32> to vector<8x1xf32>
    %26 = math.sqrt %25 : vector<8x1xf32>
    %cst_16 = arith.constant 9.99999996E-13 : f32
    %27 = vector.broadcast %cst_16 : f32 to vector<8x1xf32>
    %28 = arith.maximumf %26, %27 : vector<8x1xf32>
    %29 = vector.broadcast %28 : vector<8x1xf32> to vector<8x32xf32>
    %30 = arith.divf %3, %29 : vector<8x32xf32>
    %31 = tpu.concatenate %30, %6 in 0 : vector<8x32xf32>, vector<16x32xf32> -> vector<24x32xf32>
    %32 = arith.truncf %31 : vector<24x32xf32> to vector<24x32xbf16>
    %33 = arith.truncf %22 : vector<8x32xf32> to vector<8x32xbf16>
    %cst_17 = arith.constant dense<0.000000e+00> : vector<8x24xf32>
    %34 = tpu.matmul %33, %32, %cst_17 {dimension_numbers = #tpu.dot_dimension_numbers<[1], [1], [0], [0], [0, 0, 1, 0], [], []>} : vector<8x32xbf16>, vector<24x32xbf16>, vector<8x24xf32> -> vector<8x24xf32>
    %35 = arith.mulf %22, %30 : vector<8x32xf32>
    %cst_18 = arith.constant dense<0.000000e+00> : vector<8xf32>
    %36 = vector.multi_reduction <add>, %35, %cst_18 [1] : vector<8x32xf32> to vector<8xf32>
    %37 = vector.shape_cast %36 : vector<8xf32> to vector<8x1xf32>
    %38 = tpu.concatenate %22, %22 in 0 : vector<8x32xf32>, vector<8x32xf32> -> vector<16x32xf32>
    %39 = arith.mulf %38, %6 : vector<16x32xf32>
    %cst_19 = arith.constant dense<0.000000e+00> : vector<16xf32>
    %40 = vector.multi_reduction <add>, %39, %cst_19 [1] : vector<16x32xf32> to vector<16xf32>
    %41 = vector.shape_cast %40 : vector<16xf32> to vector<16x1xf32>
    %cst_20 = arith.constant 0.000000e+00 : f32
    %42 = vector.broadcast %cst_20 : f32 to vector<8x1xf32>
    %43 = arith.subf %42, %37 : vector<8x1xf32>
    %cst_21 = arith.constant 1.000000e+01 : f32
    %44 = vector.broadcast %cst_21 : f32 to vector<8x1xf32>
    %45 = arith.mulf %43, %44 : vector<8x1xf32>
    %46 = vector.extract_strided_slice %34 {offsets = [0, 0], sizes = [8, 8], strides = [1, 1]} : vector<8x24xf32> to vector<8x8xf32>
    %cst_22 = arith.constant 1.000000e+01 : f32
    %47 = vector.broadcast %cst_22 : f32 to vector<8x8xf32>
    %48 = arith.mulf %46, %47 : vector<8x8xf32>
    %cst_23 = arith.constant dense<0xFF800000> : vector<8xf32>
    %49 = vector.multi_reduction <maximumf>, %48, %cst_23 [1] : vector<8x8xf32> to vector<8xf32>
    %50 = vector.shape_cast %49 : vector<8xf32> to vector<8x1xf32>
    %51 = vector.broadcast %50 : vector<8x1xf32> to vector<8x8xf32>
    %52 = arith.subf %48, %51 : vector<8x8xf32>
    %53 = math.exp %52 : vector<8x8xf32>
    %cst_24 = arith.constant dense<0.000000e+00> : vector<8xf32>
    %54 = vector.multi_reduction <add>, %53, %cst_24 [1] : vector<8x8xf32> to vector<8xf32>
    %55 = vector.shape_cast %54 : vector<8xf32> to vector<8x1xf32>
    %56 = math.log %55 : vector<8x1xf32>
    %57 = arith.addf %50, %56 : vector<8x1xf32>
    %58 = arith.addf %45, %57 : vector<8x1xf32>
    %cst_25 = arith.constant 0.000000e+00 : f32
    %59 = vector.broadcast %cst_25 : f32 to vector<8x1xf32>
    %60 = vector.extract_strided_slice %34 {offsets = [0, 8], sizes = [8, 8], strides = [1, 1]} : vector<8x24xf32> to vector<8x8xf32>
    %61 = vector.extract_strided_slice %8 {offsets = [0, 0], sizes = [1, 8], strides = [1, 1]} : vector<2x8xf32> to vector<1x8xf32>
    %62 = vector.extract_strided_slice %10 {offsets = [0, 0], sizes = [1, 8], strides = [1, 1]} : vector<2x8xf32> to vector<1x8xf32>
    %63 = vector.extract_strided_slice %8 {offsets = [0, 0], sizes = [1, 1], strides = [1, 1]} : vector<2x8xf32> to vector<1x1xf32>
    %64 = vector.shape_cast %62 : vector<1x8xf32> to vector<1x8xf32>
    %65 = vector.broadcast %64 : vector<1x8xf32> to vector<8x8xf32>
    %66 = vector.shape_cast %61 : vector<1x8xf32> to vector<1x8xf32>
    %67 = vector.broadcast %66 : vector<1x8xf32> to vector<8x8xf32>
    %68 = arith.select %14, %65, %67 : vector<8x8xi1>, vector<8x8xf32>
    %69 = vector.shape_cast %63 : vector<1x1xf32> to vector<1x1xf32>
    %70 = vector.broadcast %69 : vector<1x1xf32> to vector<8x8xf32>
    %71 = arith.select %13, %70, %68 : vector<8x8xi1>, vector<8x8xf32>
    %72 = vector.extract_strided_slice %41 {offsets = [0, 0], sizes = [8, 1], strides = [1, 1]} : vector<16x1xf32> to vector<8x1xf32>
    %cst_26 = arith.constant 0.000000e+00 : f32
    %73 = vector.broadcast %cst_26 : f32 to vector<8x1xf32>
    %74 = arith.subf %73, %72 : vector<8x1xf32>
    %75 = vector.broadcast %63 : vector<1x1xf32> to vector<8x1xf32>
    %76 = arith.mulf %74, %75 : vector<8x1xf32>
    %77 = arith.mulf %60, %71 : vector<8x8xf32>
    %cst_27 = arith.constant dense<0xFF800000> : vector<8xf32>
    %78 = vector.multi_reduction <maximumf>, %77, %cst_27 [1] : vector<8x8xf32> to vector<8xf32>
    %79 = vector.shape_cast %78 : vector<8xf32> to vector<8x1xf32>
    %80 = vector.broadcast %79 : vector<8x1xf32> to vector<8x8xf32>
    %81 = arith.subf %77, %80 : vector<8x8xf32>
    %82 = math.exp %81 : vector<8x8xf32>
    %cst_28 = arith.constant dense<0.000000e+00> : vector<8xf32>
    %83 = vector.multi_reduction <add>, %82, %cst_28 [1] : vector<8x8xf32> to vector<8xf32>
    %84 = vector.shape_cast %83 : vector<8xf32> to vector<8x1xf32>
    %85 = math.log %84 : vector<8x1xf32>
    %86 = arith.addf %79, %85 : vector<8x1xf32>
    %87 = arith.addf %76, %86 : vector<8x1xf32>
    %88 = arith.addf %59, %87 : vector<8x1xf32>
    %cst_29 = arith.constant 0.333333343 : f32
    %89 = vector.broadcast %cst_29 : f32 to vector<8x1xf32>
    %90 = arith.mulf %88, %89 : vector<8x1xf32>
    %91 = vector.extract_strided_slice %34 {offsets = [0, 16], sizes = [8, 8], strides = [1, 1]} : vector<8x24xf32> to vector<8x8xf32>
    %92 = vector.extract_strided_slice %8 {offsets = [1, 0], sizes = [1, 8], strides = [1, 1]} : vector<2x8xf32> to vector<1x8xf32>
    %93 = vector.extract_strided_slice %10 {offsets = [1, 0], sizes = [1, 8], strides = [1, 1]} : vector<2x8xf32> to vector<1x8xf32>
    %94 = vector.extract_strided_slice %8 {offsets = [1, 0], sizes = [1, 1], strides = [1, 1]} : vector<2x8xf32> to vector<1x1xf32>
    %95 = vector.shape_cast %93 : vector<1x8xf32> to vector<1x8xf32>
    %96 = vector.broadcast %95 : vector<1x8xf32> to vector<8x8xf32>
    %97 = vector.shape_cast %92 : vector<1x8xf32> to vector<1x8xf32>
    %98 = vector.broadcast %97 : vector<1x8xf32> to vector<8x8xf32>
    %99 = arith.select %14, %96, %98 : vector<8x8xi1>, vector<8x8xf32>
    %100 = vector.shape_cast %94 : vector<1x1xf32> to vector<1x1xf32>
    %101 = vector.broadcast %100 : vector<1x1xf32> to vector<8x8xf32>
    %102 = arith.select %13, %101, %99 : vector<8x8xi1>, vector<8x8xf32>
    %103 = vector.extract_strided_slice %41 {offsets = [8, 0], sizes = [8, 1], strides = [1, 1]} : vector<16x1xf32> to vector<8x1xf32>
    %cst_30 = arith.constant 0.000000e+00 : f32
    %104 = vector.broadcast %cst_30 : f32 to vector<8x1xf32>
    %105 = arith.subf %104, %103 : vector<8x1xf32>
    %106 = vector.broadcast %94 : vector<1x1xf32> to vector<8x1xf32>
    %107 = arith.mulf %105, %106 : vector<8x1xf32>
    %108 = arith.mulf %91, %102 : vector<8x8xf32>
    %cst_31 = arith.constant dense<0xFF800000> : vector<8xf32>
    %109 = vector.multi_reduction <maximumf>, %108, %cst_31 [1] : vector<8x8xf32> to vector<8xf32>
    %110 = vector.shape_cast %109 : vector<8xf32> to vector<8x1xf32>
    %111 = vector.broadcast %110 : vector<8x1xf32> to vector<8x8xf32>
    %112 = arith.subf %108, %111 : vector<8x8xf32>
    %113 = math.exp %112 : vector<8x8xf32>
    %cst_32 = arith.constant dense<0.000000e+00> : vector<8xf32>
    %114 = vector.multi_reduction <add>, %113, %cst_32 [1] : vector<8x8xf32> to vector<8xf32>
    %115 = vector.shape_cast %114 : vector<8xf32> to vector<8x1xf32>
    %116 = math.log %115 : vector<8x1xf32>
    %117 = arith.addf %110, %116 : vector<8x1xf32>
    %118 = arith.addf %107, %117 : vector<8x1xf32>
    %119 = arith.addf %90, %118 : vector<8x1xf32>
    %cst_33 = arith.constant 0.333333343 : f32
    %120 = vector.broadcast %cst_33 : f32 to vector<8x1xf32>
    %121 = arith.mulf %119, %120 : vector<8x1xf32>
    %122 = arith.addf %58, %121 : vector<8x1xf32>
    %c0_34 = arith.constant 0 : index
    %c0_35 = arith.constant 0 : index
    %c0_36 = arith.constant 0 : index
    %123 = vector.load %arg6[%c0_34, %c0_35, %c0_36] : memref<1x8x1xf32, #tpu.memory_space<vmem>>, vector<1x8x1xf32>
    %124 = vector.shape_cast %123 : vector<1x8x1xf32> to vector<8x1xf32>
    %125 = vector.shape_cast %122 : vector<8x1xf32> to vector<1x8x1xf32>
    tpu.vector_store %arg6[%c0_34, %c0_35, %c0_36], %125 {strides = array<i32>} : memref<1x8x1xf32, #tpu.memory_space<vmem>>, vector<1x8x1xf32>,
    return
  }
  func.func @transform_0(%arg0: i32) -> (i32, i32, i32) {
    %c0_i32 = arith.constant 0 : i32
    %c0_i32_0 = arith.constant 0 : i32
    %c0_i32_1 = arith.constant 0 : i32
    return %arg0, %c0_i32, %c0_i32_0 : i32, i32, i32
  }
  func.func @transform_1(%arg0: i32) -> (i32, i32, i32) {
    %c0_i32 = arith.constant 0 : i32
    %c0_i32_0 = arith.constant 0 : i32
    %c0_i32_1 = arith.constant 0 : i32
    return %arg0, %c0_i32, %c0_i32_0 : i32, i32, i32
  }
  func.func @transform_2(%arg0: i32) -> (i32, i32, i32) {
    %c0_i32 = arith.constant 0 : i32
    %c0_i32_0 = arith.constant 0 : i32
    %c0_i32_1 = arith.constant 0 : i32
    return %arg0, %c0_i32, %c0_i32_0 : i32, i32, i32
  }
  func.func @transform_3(%arg0: i32) -> (i32, i32, i32) {
    %c0_i32 = arith.constant 0 : i32
    %c0_i32_0 = arith.constant 0 : i32
    %c0_i32_1 = arith.constant 0 : i32
    return %arg0, %c0_i32, %c0_i32_0 : i32, i32, i32
  }
  func.func @transform_4(%arg0: i32) -> (i32, i32, i32) {
    %c0_i32 = arith.constant 0 : i32
    %c0_i32_0 = arith.constant 0 : i32
    %c0_i32_1 = arith.constant 0 : i32
    return %arg0, %c0_i32, %c0_i32_0 : i32, i32, i32
  }
  func.func @transform_5(%arg0: i32) -> (i32, i32, i32) {
    %c0_i32 = arith.constant 0 : i32
    %c0_i32_0 = arith.constant 0 : i32
    %c0_i32_1 = arith.constant 0 : i32
    return %arg0, %c0_i32, %c0_i32_0 : i32, i32, i32
  }
}

</mosaic_0001>

<bundles_post_ra>
// kernel: tpu_custom_call.1
= control target key start
LH: loop header
LB: loop body
LE: loop exit
PB: predicated region body
PF: predicated region fallthrough
CT: control target
= control target key end

     0   :  { %10 = vsyncpa [#allocation3], 0  ;;  %s1209_s0 = inlined_call_operand.hbm [shape: f32[2,8,32], index: 0, kind: input, shape index: {}]   ;;  %s1210_s1 = inlined_call_operand.hbm [shape: f32[2,8,32], index: 1, kind: input, shape index: {}]   ;;  %s1211_s2 = inlined_call_operand.hbm [shape: bf16[2,16,32], index: 2, kind: input, shape index: {}]   ;;  %s1212_s3 = inlined_call_operand.vmem [shape: f32[2,2,8], index: 3, kind: input, shape index: {}]   ;;  %s1213_s4 = inlined_call_operand.vmem [shape: f32[2,2,8], index: 4, kind: input, shape index: {}]   ;;  %s1214_s5 = inlined_call_operand.vmem [shape: f32[2,8,1], index: 5, kind: output, shape index: {}]  }
   0x1   :  { %12 = vsyncpa [#allocation3 + $0x1], 0 }
   0x2   :  { %13 = vsyncpa [#allocation5], 0 }
   0x3   :  { %15 = vsyncpa [#allocation5 + $0x1], 0  ;;  %s976_s18 = smov 0   ;;  %s978_s19 = smov 0  }
   0x4   :  { %s980_s20 = smov 0   ;;  %s982_s21 = smov 0  }
   0x5 LB: > { %s995_s22 = sadd.s32 4294967295, %s933_s21   ;;  %s998_s23 = sadd.s32 1, %s933_s21   ;;  %s933_s21 = sphi %s982_s21, %s1228_s21   ;;  %s929_s20 = sphi %s980_s20, %s1227_s20   ;;  %s925_s19 = sphi %s978_s19, %s1226_s19   ;;  %s921_s18 = sphi %s976_s18, %s1225_s18  }
   0x6   : > { %s25_s24 = ssub.s32 %s933_s21, %s998_s23  ;;  %s28_s25 = sadd.s32 1, %s929_s20 }
   0x7   : > { %p26_p0 = scmp.eq.s32.totalorder %s25_s24, 0  ;;  %p35_p1 = scmp.ne.s32.totalorder %s929_s20, %s925_s19 }
   0x8   : > { %p36_p2 = scmp.eq.s32.totalorder %s933_s21, 0  ;;  %p41_p3 = scmp.ne.s32.totalorder %s925_s19, %s921_s18 }
   0x9   : > { %s1008_s26 = scalar_select %p26_p0, %s929_s20, %s28_s25  }
   0xa   : > { %p37_p4 = por %p36_p2, %p35_p1  ;;  %p42_p5 = scmp.eq.s32.totalorder %s995_s22, 0 }
   0xb   : > { %p743_p6 = scmp.lt.s32.totalorder %s933_s21, 2  ;;  %s195_s28 = sand.u32 1, %s929_s20  }
   0xc   : > { %p1012_p7 = por %p42_p5, %p41_p3  ;;  %s1019_s29 = sshll.u32 %s195_s28, 3 }
   0xd   : > { %s1022_s30 = sshll.u32 %s933_s21, 7  ;;  %p1024_p8 = pnand %p743_p6, %p37_p4 }
   0xe   : > { %s1218_s27 = scalar_select %p1012_p7, 1, 0 }
   0xf   : > { %s1219_s6 = scalar_select %p1024_p8, 1, 0 }
  0x10   : > { %s213_s7 = sand.u32 1, %s933_s21   ;;  %s1033_s10 = scalar_lea.hbm %s1210_s1, %s1022_s30 }
  0x11   : > { %s217_s11 = scalar_lea.vmem [#allocation4], %s1019_s29  ;;  %s1042_s15 = scalar_lea.hbm %s1211_s2, %s1022_s30 }
  0x12   : > { %s224_s12 = sshll.u32 %s217_s11, 4  ;;  %s1044_s16 = scalar_lea.sflag [#allocation5], %s213_s7  ;;  %s1036_s12 = int_to_ptr.vmem [resolvable:$true] %s224_s12 }
  0x13   : > { %s805_s17 = scalar_lea.hbm %s1033_s10, 128  ;;  %p1050_p10 = pneg %p1024_p8 }
  0x14   : > { %p806_p9 = scmp.ne.s32.totalorder %s1033_s10, %s805_s17  ;;  %s810_s8 = scalar_lea.hbm %s1210_s1, 256 }
  0x15   : > { %p811_p13 = scmp.lt.u32.totalorder %s1033_s10, %s1210_s1  ;;  %p812_p0 = scmp.lt.u32.totalorder %s810_s8, %s805_s17 }
  0x16   : > { %p808_p11 = pnand %p1050_p10, %p806_p9  ;;  %p814_p2 = scmp.lt.u32.totalorder %s805_s17, %s1033_s10 }
  0x17   : > { %p813_p1 = por %p812_p0, %p811_p13 }
  0x18   : > { %p809_p12 = pneg %p808_p11 }
  0x19   : > { %p815_p3 = por %p814_p2, %p813_p1 }
  0x1b   : > { %p816_p4 = pnand %p815_p3, %p809_p12 }
  0x1d   : > { %819 = shalt.err (!%p816_p4)
}
  0x1e   : > { %s820_s7 = scalar_lea.vmem %s1036_s12, 128  ;;  %s935_s13 = smov [#allocation4]  }
  0x1f   : > { %p821_p5 = scmp.ne.s32.totalorder %s1036_s12, %s820_s7  ;;  %s825_s14 = sshll.u32 %s935_s13, 4  ;;  %s826_s14 = int_to_ptr.vmem [resolvable:$false] %s825_s14 }
  0x20   : > { %s827_s24 = scalar_lea.vmem %s826_s14, 256  ;;  %p828_p11 = scmp.lt.s32.totalorder %s1036_s12, %s826_s14 }
  0x21   : > { %p823_p6 = pnand %p821_p5, %p1050_p10  ;;  %p829_p7 = scmp.lt.s32.totalorder %s827_s24, %s820_s7 }
  0x23   : > { %p824_p9 = pneg %p823_p6  ;;  %p830_p13 = por %p829_p7, %p828_p11 }
  0x25   : > { %p831_p0 = pnand %p830_p13, %p824_p9 }
  0x27   : > { %834 = shalt.err (!%p831_p0)
}
  0x28   : > { %739 = dma.hbm_to_vmem [thread:$0]  (!%p1024_p8), %s1033_s10, 128, %s1036_s12, %s1044_s16  }
  0x29   : > { %s235_s17 = scalar_lea.vmem [#allocation6], %s1019_s29  ;;  %p700_p12 = scmp.ge.s32.totalorder %s933_s21, 1 }
  0x2a   : > { %s242_s25 = sshll.u32 %s235_s17, 4  ;;  %p264_p7 = scmp.lt.s32.totalorder %s933_s21, 3  ;;  %s1076_s25 = int_to_ptr.vmem [resolvable:$true] %s242_s25 }
  0x2b   : > { %s1087_s7 = scalar_lea.hbm %s1209_s0, %s1022_s30  ;;  %s199_s10 = scalar_lea.vmem [#allocation2], %s1019_s29 }
  0x2c   : > { %p1079_p1 = pnand %p700_p12, %p264_p7  ;;  %s206_s12 = sshll.u32 %s199_s10, 4  ;;  %s207_s12 = int_to_ptr.vmem [resolvable:$true] %s206_s12 }
  0x2d   : > { %s196_s13 = scalar_lea.sflag [#allocation3], %s195_s28  ;;  %s835_s14 = scalar_lea.hbm %s1087_s7, 128 }
  0x2e   : > { %s1221_s8 = scalar_select %p1079_p1, 1, 0 }
  0x2f   : > { %p836_p2 = scmp.ne.s32.totalorder %s1087_s7, %s835_s14  ;;  %s840_s17 = scalar_lea.hbm %s1209_s0, 256 }
  0x30   : > { %p841_p5 = scmp.lt.u32.totalorder %s1087_s7, %s1209_s0  ;;  %p842_p6 = scmp.lt.u32.totalorder %s840_s17, %s835_s14 }
  0x31   : > { %p838_p3 = pnand %p836_p2, %p1050_p10  ;;  %p844_p11 = scmp.lt.u32.totalorder %s835_s14, %s1087_s7 }
  0x32   : > { %p843_p9 = por %p842_p6, %p841_p5 }
  0x33   : > { %p839_p4 = pneg %p838_p3 }
  0x34   : > { %p845_p13 = por %p844_p11, %p843_p9 }
  0x36   : > { %p846_p0 = pnand %p845_p13, %p839_p4 }
  0x38   : > { %849 = shalt.err (!%p846_p0)
}
  0x39   : > { %s850_s28 = scalar_lea.vmem %s207_s12, 128  ;;  %s936_s29 = smov [#allocation2]  }
  0x3a   : > { %p851_p12 = scmp.ne.s32.totalorder %s207_s12, %s850_s28  ;;  %s855_s11 = sshll.u32 %s936_s29, 4  ;;  %s856_s11 = int_to_ptr.vmem [resolvable:$false] %s855_s11 }
  0x3b   : > { %s857_s10 = scalar_lea.vmem %s856_s11, 256  ;;  %p858_p3 = scmp.lt.s32.totalorder %s207_s12, %s856_s11 }
  0x3c   : > { %p853_p7 = pnand %p851_p12, %p1050_p10  ;;  %p859_p1 = scmp.lt.s32.totalorder %s857_s10, %s850_s28 }
  0x3e   : > { %p854_p2 = pneg %p853_p7  ;;  %p860_p8 = por %p859_p1, %p858_p3 }
  0x40   : > { %p861_p5 = pnand %p860_p8, %p854_p2 }
  0x42   : > { %864 = shalt.err (!%p861_p5)
}
  0x43   : > { %p1222_p6 = scmp.ne.s32.totalorder %s1219_s6, 0  ;;  %s865_s14 = scalar_lea.hbm %s1042_s15, 128 }
  0x44   : > { %p866_p4 = scmp.ne.s32.totalorder %s1042_s15, %s865_s14  ;;  %s870_s17 = scalar_lea.hbm %s1211_s2, 256 }
  0x45   : > { %736 = dma.hbm_to_vmem [thread:$0]  (!%p1222_p6), %s1087_s7, 128, %s207_s12, %s196_s13  }
  0x46   : > { %p868_p9 = pnand %p866_p4, %p1050_p10  ;;  %p871_p8 = scmp.lt.u32.totalorder %s1042_s15, %s1211_s2 }
  0x47   : > { %p872_p1 = scmp.lt.u32.totalorder %s870_s17, %s865_s14  ;;  %p874_p0 = scmp.lt.u32.totalorder %s865_s14, %s1042_s15 }
  0x48   : > { %p869_p11 = pneg %p868_p9 }
  0x49   : > { %p873_p13 = por %p872_p1, %p871_p8 }
  0x4b   : > { %p875_p12 = por %p874_p0, %p873_p13 }
  0x4d   : > { %p876_p7 = pnand %p875_p12, %p869_p11 }
  0x4f   : > { %879 = shalt.err (!%p876_p7)
}
  0x50   : > { %s880_s7 = scalar_lea.vmem %s1076_s25, 128  ;;  %s937_s12 = smov [#allocation6]  }
  0x51   : > { %p881_p2 = scmp.ne.s32.totalorder %s1076_s25, %s880_s7  ;;  %s885_s13 = sshll.u32 %s937_s12, 4  ;;  %s886_s13 = int_to_ptr.vmem [resolvable:$false] %s885_s13 }
  0x52   : > { %s887_s28 = scalar_lea.vmem %s886_s13, 256  ;;  %p888_p4 = scmp.lt.s32.totalorder %s1076_s25, %s886_s13 }
  0x53   : > { %p883_p3 = pnand %p881_p2, %p1050_p10  ;;  %p889_p9 = scmp.lt.s32.totalorder %s887_s28, %s880_s7 }
  0x55   : > { %p884_p5 = pneg %p883_p3  ;;  %p890_p8 = por %p889_p9, %p888_p4 }
  0x57   : > { %p891_p1 = pnand %p890_p8, %p884_p5 }
  0x59   : > { %894 = shalt.err (!%p891_p1)
}
  0x5a   : > { %s938_s29 = smov 64   ;;  %s939_s11 = smov 4  }
  0x5b   : > { %742 = dma.hbm_to_vmem [thread:$0]  (!%p1222_p6), %s1042_s15, 128, %s1076_s25, %s1044_s16, %s938_s29, %s938_s29, %s939_s11  }
  0x5c   : > { %p1223_p10 = scmp.ne.s32.totalorder %s1221_s8, 0 }
  0x5d   : > { %s270_s18 = sand.u32 (!%p1223_p10), 1, %s925_s19   ;;  %p1224_p11 = scmp.ne.s32.totalorder (!%p1223_p10), %s1218_s27, 0 }
  0x5e   : > { %268 = sbr.rel (%p1223_p10) target bundleno = 958 (0x3be), region = 40  ;;  %s1134_s10 = sshll.u32 (!%p1223_p10), %s270_s18, 3 }
  0x5f   : > { %s271_s14 = scalar_lea.sflag (!%p1223_p10), [#allocation3], %s270_s18  ;;  %s274_s21 = scalar_lea.vmem (!%p1223_p10), [#allocation2], %s1134_s10 }
  0x65   : > { %912 = dma.done.wait (%p1224_p11), %s271_s14, 128  }
  0x66   : > { %914 = vsyncadd (%p1224_p11), %s271_s14, 4294967168  ;;  %s279_s6 = sand.u32 1, %s995_s22   ;;  %s283_s16 = scalar_lea.vmem [#allocation4], %s1134_s10 }
  0x67   : > { %s280_s15 = scalar_lea.sflag [#allocation5], %s279_s6 }
  0x68   : > { %916 = dma.done.wait (%p1224_p11), %s280_s15, 256  }
  0x69   : > { %918 = vsyncadd (%p1224_p11), %s280_s15, 4294967040  ;;  %v1147_v0 = vld [vmem:[%s283_s16] sm:$0xff]  ;;  %vm364_vm0 = vcmask 261120   ;;  %v1149_v1 = vld [vmem:[%s274_s21] sm:$0xff]  ;;  %v940_v6 = vmov 0.0   ;;  %vm941_vm1 = vmmov 0   ;;  %v357_v9 = vlaneseq }
  0x6a   : > { %v378_v2 = vmul.f32 %v1147_v0, %v1147_v0  ;;  %v363_v3 = vmul.f32 %v1149_v1, %v1149_v1  ;;  %715 = vmatprep.subr.bf16.mxu0 %v940_v6  ;;  %719 = vmatprep.mubr.msk.bf16.mxu0 %vm941_vm1, %v940_v6  ;;  %p336_p6 = scmp.lt.s32.totalorder %s995_s22, 1  ;;  %s942_s13 = smov 8   ;;  %vm535_vm8 = vcmask 195712   ;;  %vm494_vm9 = vcmask 130112  }
  0x6b   : > { %v358_v10 = vshrl.u32 %v357_v9, 7  ;;  %v360_v13 = vand.u32 127, %v357_v9  ;;  %s943_s28 = smov 16   ;;  %s292_s29 = scalar_lea.vmem [#allocation6], %s1134_s10  ;;  %vm459_vm10 = vcmask 64512   ;;  %vm556_vm11 = vcmask 7168  }
  0x6c   : > { %v379_v4 = vsel %vm364_vm0, %v378_v2, 0.0  ;;  %v365_v5 = vsel %vm364_vm0, %v363_v3, 0.0  ;;  %s1230_s22 = smov (!%p336_p6, %s995_s22), 1  ;;  %v351_v39 = vld [vmem:[%s292_s29] sm:$0xf]  ;;  %s944_s11 = smov 120  }
  0x6d   : > { %380 = vadd.xlane.f32.xlu0 %v379_v4  ;;  %s704_s27 = sshll.u32 %s1230_s22, 1  ;;  %v475_v11 = vsub.s32 0, %v358_v10  ;;  %v516_v14 = vsub.s32 1, %v358_v10  ;;  %vm362_vm2 = vcmp.lt.s32.totalorder %v360_v13, %v358_v10  ;;  %vm361_vm3 = vcmp.eq.s32.totalorder %v358_v10, %v360_v13  ;;  %v352_v42 = vld [vmem:[%s292_s29 + $0x4] sm:$0xf]  ;;  %s945_s18 = smov 112  }
  0x6e   : > { %s339_s24 = scalar_lea.vmem %s1212_s3, %s704_s27  ;;  %s343_s9 = scalar_lea.vmem %s1213_s4, %s704_s27  ;;  %v353_v40 = vunpack.c.l.bf16 %v351_v39  ;;  %v354_v45 = vunpack.c.l.bf16 %v352_v42  ;;  %v707_v49 = vcombine.low %v352_v42, %v352_v42 }
  0x6f   : > { %v355_v7 = vld [vmem:[%s339_s24] sm:$0x3]  ;;  %s706_s10 = sshll.u32 %s1230_s22, 3 }
  0x70   : > { %723 = vpush %v355_v7  ;;  %v523_v8 = vrot.slane %v355_v7, 1  ;;  %v356_v12 = vld [vmem:[%s343_s9] sm:$0x3]  ;;  %v1170_v16 = vrot.slane %v355_v7, %v475_v11  ;;  %v1172_v18 = vrot.slane %v355_v7, %v516_v14  ;;  %v402_v53 = vsel %vm364_vm0, %v707_v49, 0  ;;  %s347_s6 = scalar_lea.vmem %s1214_s5, %s706_s10 }
  0x71   : > { %366 = vadd.xlane.f32.xlu0 %v365_v5  ;;  %v476_v15 = vrot.slane %v356_v12, %v475_v11  ;;  %v517_v17 = vrot.slane %v356_v12, %v516_v14 }
  0x72   : > { %725 = vpush %v523_v8 }
  0x73   : > { %v481_v19 = vsel %vm362_vm2, %v476_v15, %v1170_v16  ;;  %v522_v21 = vsel %vm362_vm2, %v517_v17, %v1172_v18 }
  0xa1   : > { %s724_s7 = spop %723 }
  0xa2   : > { %v484_v20 = vstv %s724_s7 }
  0xa3   : > { %v486_v22 = vsel %vm361_vm3, %v484_v20, %v481_v19  ;;  %s726_s12 = spop %725 }
  0xa4   : > { %490 = vrot.lane.b32.xlu1 %v486_v22, %s942_s13  ;;  %v525_v23 = vstv %s726_s12 }
  0xa5   : > { %v527_v24 = vsel %vm361_vm3, %v525_v23, %v522_v21 }
  0xa8   : > { %531 = vrot.lane.b32.xlu1 %v527_v24, %s943_s28 }
  0xfa   : > { %v381_v25 = vpop.xlane.xlu0 %380 }
  0xfb   : > { %785 = vrsqrt.f32 %v381_v25  ;;  %vm384_vm4 = vcmp.eq.f32.partialorder %v381_v25, inf  ;;  %v387_v29 = vand.u32 2147483648, %v381_v25  ;;  %vm386_vm5 = vcmp.eq.f32.partialorder %v381_v25, 0.0 }
  0xfe   : > { %v367_v26 = vpop.xlane.xlu0 %366 }
  0xff   : > { %787 = vrsqrt.f32 %v367_v26  ;;  %vm370_vm6 = vcmp.eq.f32.partialorder %v367_v26, inf  ;;  %v373_v33 = vand.u32 2147483648, %v367_v26  ;;  %vm372_vm7 = vcmp.eq.f32.partialorder %v367_v26, 0.0 }
 0x105   : > { %v786_v27 = vpop.eup %785 }
 0x106   : > { %v383_v28 = vmul.f32 %v786_v27, %v381_v25 }
 0x108   : > { %v385_v30 = vsel %vm384_vm4, %v381_v25, %v383_v28 }
 0x109   : > { %v788_v31 = vpop.eup %787  ;;  %v388_v32 = vsel %vm386_vm5, %v387_v29, %v385_v30 }
 0x10a   : > { %v389_v34 = vmax.f32 %v388_v32, 1e-12  ;;  %v369_v35 = vmul.f32 %v788_v31, %v367_v26 }
 0x10c   : > { %789 = vrcp.f32 %v389_v34  ;;  %v371_v36 = vsel %vm370_vm6, %v367_v26, %v369_v35 }
 0x10d   : > { %v374_v37 = vsel %vm372_vm7, %v373_v33, %v371_v36 }
 0x10e   : > { %v375_v38 = vmax.f32 %v374_v37, 1e-12 }
 0x110   : > { %791 = vrcp.f32 %v375_v38 }
 0x116   : > { %v790_v41 = vpop.eup %789  ;;  %v491_v55 = vpop.permute.xlu1 %490 }
 0x117   : > { %v391_v43 = vmul.f32 %v790_v41, %v1147_v0 }
 0x119   : > { %v392_v44 = vpack.c.bf16 %v353_v40, %v391_v43 }
 0x11a   : > { %v792_v46 = vpop.eup %791  ;;  %v532_v56 = vpop.permute.xlu1 %531 }
 0x11b   : > { %v399_v47 = vsel %vm364_vm0, %v392_v44, 0  ;;  %v377_v48 = vmul.f32 %v792_v46, %v1149_v1 }
 0x11c   : > { %716 = vmatpush3.bf16.xpose.msra.mxu0 %v399_v47 }
 0x11d   : > { %717 = vmatprep.subr.bf16.mxu0 %v940_v6  ;;  %v448_v50 = vmul.f32 %v377_v48, %v353_v40  ;;  %v449_v51 = vmul.f32 %v377_v48, %v354_v45  ;;  %v444_v52 = vmul.f32 %v391_v43, %v377_v48  ;;  %v394_v54 = vpack.c.bf16 %v377_v48, %v377_v48 }
 0x11f   : > { %v450_v22 = vsel %vm364_vm0, %v448_v50, 0.0  ;;  %v453_v23 = vsel %vm364_vm0, %v449_v51, 0.0  ;;  %v445_v24 = vsel %vm364_vm0, %v444_v52, 0.0 }
 0x124   : > { %718 = vmatpush3.bf16.xpose.msra.mxu0 %v402_v53 }
 0x12b   : > { %720 = vmatmul.mubr.msk.bf16.vlgmr.msra.gmra.mrb[0].mxu0 %vm364_vm0, %v394_v54 }
 0x1fe   : > { %v438_v57 = vpop.f32.mrb[0].mxu0 }
 0x1ff   : > { %v721_v58 = vpop.f32.mrb[1].mxu0  ;;  %v534_v59 = vmul.f32 %v532_v56, %v438_v57  ;;  %v493_v60 = vmul.f32 %v491_v55, %v438_v57  ;;  %v458_v1 = vmul.f32 10.0, %v438_v57 }
 0x200   : > { %v441_v61 = vpop.f32.mrb[2].mxu0 }
 0x201   : > { %v722_v62 = vpop.f32.mrb[3].mxu0  ;;  %v536_v63 = vsel %vm535_vm8, %v534_v59, -inf  ;;  %v495_v0 = vsel %vm494_vm9, %v493_v60, -inf  ;;  %v460_v2 = vsel %vm459_vm10, %v458_v1, -inf }
 0x202   : > { %537 = vmax.xlane.f32.xlu1 %v536_v63  ;;  %496 = vmax.xlane.f32.xlu0 %v495_v0 }
 0x206   : > { %461 = vmax.xlane.f32.xlu0 %v460_v2 }
 0x28f   : > { %v538_v3 = vpop.xlane.xlu1 %537  ;;  %v497_v4 = vpop.xlane.xlu0 %496 }
 0x290   : > { %v498_v5 = vsub.f32 %v493_v60, %v497_v4  ;;  %v539_v6 = vsub.f32 %v534_v59, %v538_v3 }
 0x292   : > { %v499_v7 = vmul.f32 1.442695, %v498_v5  ;;  %v540_v8 = vmul.f32 1.442695, %v539_v6 }
 0x293   : > { %v462_v11 = vpop.xlane.xlu0 %461 }
 0x294   : > { %793 = vpow2.f32 %v499_v7  ;;  %v463_v12 = vsub.f32 %v458_v1, %v462_v11 }
 0x295   : > { %795 = vpow2.f32 %v540_v8 }
 0x296   : > { %v464_v13 = vmul.f32 1.442695, %v463_v12 }
 0x298   : > { %797 = vpow2.f32 %v464_v13 }
 0x29e   : > { %v794_v9 = vpop.eup %793 }
 0x29f   : > { %502 = vrot.lane.b32.xlu0 %v794_v9, %s944_s11  ;;  %v796_v10 = vpop.eup %795 }
 0x2a2   : > { %v798_v20 = vpop.eup %797 }
 0x2a3   : > { %543 = vrot.lane.b32.xlu0 %v796_v10, %s945_s18  ;;  %v466_v21 = vsel %vm459_vm10, %v798_v20, 0.0 }
 0x311   : > { %v503_v14 = vpop.permute.xlu0 %502 }
 0x312   : > { %v505_v15 = vsel %vm459_vm10, %v503_v14, 0.0 }
 0x313   : > { %506 = vadd.xlane.f32.xlu0 %v505_v15 }
 0x315   : > { %v544_v17 = vpop.permute.xlu0 %543 }
 0x316   : > { %v546_v19 = vsel %vm459_vm10, %v544_v17, 0.0 }
 0x317   : > { %547 = vadd.xlane.f32.xlu1 %v546_v19 }
 0x31b   : > { %467 = vadd.xlane.f32.xlu1 %v466_v21 }
 0x31f   : > { %451 = vadd.xlane.f32.xlu1 %v450_v22 }
 0x323   : > { %454 = vadd.xlane.f32.xlu1 %v453_v23 }
 0x327   : > { %446 = vadd.xlane.f32.xlu1 %v445_v24 }
 0x3a0   : > { %v507_v25 = vpop.xlane.xlu0 %506 }
 0x3a1   : > { %799 = vlog2.f32 %v507_v25 }
 0x3a4   : > { %v548_v26 = vpop.xlane.xlu1 %547 }
 0x3a5   : > { %801 = vlog2.f32 %v548_v26 }
 0x3a8   : > { %v468_v27 = vpop.xlane.xlu1 %467 }
 0x3a9   : > { %803 = vlog2.f32 %v468_v27 }
 0x3ab   : > { %v800_v28 = vpop.eup %799 }
 0x3ac   : > { %v509_v29 = vmul.f32 0.6931472, %v800_v28  ;;  %v452_v30 = vpop.xlane.xlu1 %451 }
 0x3ad   : > { %v487_v31 = vsub.f32 0.0, %v452_v30 }
 0x3ae   : > { %v510_v32 = vadd.f32 %v509_v29, %v497_v4 }
 0x3af   : > { %v802_v33 = vpop.eup %801  ;;  %v488_v34 = vmul.f32 %v487_v31, %v1170_v16 }
 0x3b0   : > { %v550_v35 = vmul.f32 0.6931472, %v802_v33  ;;  %v455_v36 = vpop.xlane.xlu1 %454 }
 0x3b1   : > { %v511_v37 = vadd.f32 %v510_v32, %v488_v34  ;;  %v528_v38 = vsub.f32 0.0, %v455_v36 }
 0x3b2   : > { %v551_v39 = vadd.f32 %v550_v35, %v538_v3 }
 0x3b3   : > { %v804_v40 = vpop.eup %803  ;;  %v529_v41 = vmul.f32 %v528_v38, %v1172_v18  ;;  %v513_v44 = vmul.f32 0.33333334, %v511_v37 }
 0x3b4   : > { %v470_v42 = vmul.f32 0.6931472, %v804_v40  ;;  %v447_v43 = vpop.xlane.xlu1 %446 }
 0x3b5   : > { %v552_v45 = vadd.f32 %v551_v39, %v529_v41  ;;  %v456_v46 = vsub.f32 0.0, %v447_v43 }
 0x3b6   : > { %v471_v47 = vadd.f32 %v470_v42, %v462_v11 }
 0x3b7   : > { %v553_v48 = vadd.f32 %v552_v45, %v513_v44  ;;  %v457_v49 = vmul.f32 10.0, %v456_v46 }
 0x3b9   : > { %v472_v50 = vadd.f32 %v471_v47, %v457_v49  ;;  %v554_v51 = vmul.f32 0.33333334, %v553_v48 }
 0x3bb   : > { %v555_v16 = vadd.f32 %v554_v51, %v472_v50 }
 0x3bd   : > { %557 = vst.msk [vmem:[%s347_s6] sm:$0xff] %vm556_vm11, %v555_v16 }
 0x3be PF: > { %p18_p13 = scmp.ge.s32.totalorder %s998_s23, 4   ;;  %s1225_s18 = smov %s925_s19 }
 0x3bf   : > { %s1226_s19 = smov %s929_s20  ;;  %s1227_s20 = smov %s1008_s26 }
 0x3c0   : > { %s1228_s21 = smov %s998_s23  ;;  %20 = sbr.rel (!%p18_p13) target bundleno = 5 (0x5), region = 110 }
 0x3c7   :  { %577 = vsyncpa [#allocation3], 1 }
 0x3c8   :  { %579 = vsyncpa [#allocation3 + $0x1], 1 }
 0x3c9   :  { %580 = vsyncpa [#allocation5], 1 }
 0x3ca   :  { %582 = vsyncpa [#allocation5 + $0x1], 1 }

</bundles_post_ra>
